<compile_context>
chip_gen: v6e
topology: v6e:2x2x1
jax: 0.10.0
libtpu: 0.0.40
codegen_flags: <defaults>
</compile_context>

<pallas_src>
import jax
import jax.numpy as jnp
from jax.experimental import pallas as pl
from jax.experimental.pallas import tpu as pltpu

_LANES = 128
# Below this element count, a pallas_call dispatch (plus the wrapper relayout,
# which cannot fuse into an opaque custom call) costs more than the <1 us of
# HBM traffic XLA needs for the whole op.
_SMALL_N = 512 * 1024


def _relu_kernel(x_ref, o_ref):
    # Pure VPU elementwise max; the kernel is HBM-bandwidth-bound.
    o_ref[...] = jnp.maximum(x_ref[...], 0).astype(o_ref.dtype)


def _sublanes_for(itemsize: int) -> int:
    # Sublane packing per 32-bit vreg row: f32 -> 8, bf16/f16 -> 16, 8-bit -> 32.
    return {4: 8, 2: 16, 1: 32}[itemsize]


def _target_block_bytes() -> int:
    """Per-block byte budget (input block; the output block matches)."""
    target = 4 << 20  # 4 MiB: DMA time >> ~0.35 us/step overhead on v5e/v6e.
    try:
        info = pltpu.get_tpu_info()
        vmem = getattr(info, "vmem_capacity_bytes", None)
        # v7x proxy: 64 MiB VMEM/TC but ~3.2 TB/s HBM -> larger blocks amortize
        # per-step overhead; 2(in)+2(out) x 6 MiB = 24 MiB is well under 64 MiB.
        if vmem is not None and vmem <= (64 << 20):
            target = 6 << 20
    except Exception:
        pass
    return target


def relu_pallas(x: jnp.ndarray) -> jnp.ndarray:
    """Elementwise ReLU implemented as a Pallas TPU kernel."""
    orig_shape = x.shape
    orig_dtype = x.dtype
    n = x.size
    itemsize = jnp.dtype(orig_dtype).itemsize

    # Tiny tensors, non-float dtypes, or 8-byte dtypes: plain XLA is exact and
    # faster (dispatch overhead would dominate / f64 would mis-tile).
    if (
        n < _SMALL_N
        or not jnp.issubdtype(orig_dtype, jnp.floating)
        or itemsize not in (1, 2, 4)
    ):
        return jnp.maximum(x, jnp.zeros((), dtype=orig_dtype))

    sub = _sublanes_for(itemsize)

    # Lane-dense 2D view over the 128-aligned bulk of the tensor.  No jnp.pad
    # and no post-slice: the rare <128-element ragged tail is handled by XLA.
    flat = x.reshape(-1)
    n_bulk = (n // _LANES) * _LANES
    rows = n_bulk // _LANES
    x2d = (flat if n_bulk == n else flat[:n_bulk]).reshape(rows, _LANES)

    # Row tile sized by a byte budget (constant block bytes across dtypes)...
    tr = (_target_block_bytes() // (_LANES * itemsize) // sub) * sub

    # ...but guarantee multiple grid steps on medium inputs so both v7x
    # TensorCores get work and double-buffered DMA/compute overlap survives.
    if rows >= 4 * sub:
        min_steps = 4
    elif rows > sub:
        min_steps = 2
    else:
        min_steps = 1
    cap = pl.cdiv(pl.cdiv(rows, min_steps), sub) * sub
    tr = max(sub, min(tr, cap))

    block_bytes = tr * _LANES * itemsize
    grid = (pl.cdiv(rows, tr),)  # Pallas masks the partial last block.

    out2d = pl.pallas_call(
        _relu_kernel,
        out_shape=jax.ShapeDtypeStruct((rows, _LANES), orig_dtype),
        grid=grid,
        in_specs=[pl.BlockSpec((tr, _LANES), lambda i: (i, 0))],
        out_specs=pl.BlockSpec((tr, _LANES), lambda i: (i, 0)),
        compiler_params=pltpu.CompilerParams(
            dimension_semantics=("parallel",),
            # 2 double-buffered input blocks + 2 output blocks, with headroom;
            # v5e's 16 MiB default scoped limit is too small for 4 MiB blocks,
            # and the 56 MiB cap keeps us safely under v7x's 64 MiB physical.
            vmem_limit_bytes=min(
                max(32 << 20, 4 * block_bytes + (8 << 20)), 56 << 20
            ),
        ),
    )(x2d)

    out_flat = out2d.reshape(-1)
    if n_bulk != n:
        tail = jnp.maximum(flat[n_bulk:], jnp.zeros((), dtype=orig_dtype))
        out_flat = jnp.concatenate([out_flat, tail])
    return out_flat.reshape(orig_shape)


class ModelFc2:
    """JAX/Pallas equivalent of _model__fc2__1 (the layer choice is nn.ReLU)."""

    def __init__(self):
        # No parameters: the module only contains nn.ReLU().
        pass

    def __call__(self, *inputs):
        return relu_pallas(inputs[0])


if __name__ == "__main__":
    key = jax.random.PRNGKey(0)
    model = ModelFc2()
    k0, k1, k2, k3 = jax.random.split(key, 4)

    # 1) Module-sized input (2,4,16,16): small-input XLA bypass path.
    x_small = jax.random.normal(k0, (2, 4, 16, 16), dtype=jnp.float32)
    y_small = jax.block_until_ready(model(x_small))
    assert y_small.shape == x_small.shape and y_small.dtype == x_small.dtype
    assert jnp.array_equal(y_small, jnp.maximum(x_small, 0.0))

    # 2) Ragged f32 input (n % 128 != 0): Pallas bulk + XLA tail fixup,
    #    multi-step grid with a masked partial last block, no pad/slice.
    x_ragged = jax.random.normal(k1, (7, 33, 45, 51), dtype=jnp.float32)
    y_ragged = jax.block_until_ready(model(x_ragged))
    assert y_ragged.shape == x_ragged.shape and y_ragged.dtype == x_ragged.dtype
    assert jnp.array_equal(y_ragged, jnp.maximum(x_ragged, 0.0))

    # 3) 128-aligned f32 input: pure Pallas path, no tail fixup.
    x_f32 = jax.random.normal(k2, (8, 8, 128, 128), dtype=jnp.float32)
    y_f32 = jax.block_until_ready(model(x_f32))
    assert y_f32.shape == x_f32.shape and y_f32.dtype == x_f32.dtype
    assert jnp.array_equal(y_f32, jnp.maximum(x_f32, 0.0))

    # 4) bf16 input: 16-sublane packing with a byte-budgeted (not row-count) tile.
    x_bf16 = jax.random.normal(k3, (16, 8, 128, 128), dtype=jnp.bfloat16)
    y_bf16 = jax.block_until_ready(model(x_bf16))
    assert y_bf16.shape == x_bf16.shape and y_bf16.dtype == jnp.bfloat16
    assert jnp.array_equal(y_bf16, jnp.maximum(x_bf16, jnp.bfloat16(0)))

    print("KERNEL_OK")
</pallas_src>

<mosaic_0001>
module attributes {stable_mosaic.version = 11 : i64} {
  func.func @_relu_kernel(%arg0: i32, %arg1: memref<1040x128xf32, #tpu.memory_space<vmem>>, %arg2: memref<1040x128xf32, #tpu.memory_space<vmem>>) attributes {dimension_semantics = [#tpu.dimension_semantics<parallel>], iteration_bounds = array<i64: 4>, scalar_prefetch = 0 : i64, scratch_operands = 0 : i64, tpu.core_type = #tpu.core_type<tc>, window_params = [{transform_indices = @transform_0, window_bounds = array<i64: 1040, 128>}, {transform_indices = @transform_1, window_bounds = array<i64: 1040, 128>}]} {
    %c0 = arith.constant 0 : index
    %c0_0 = arith.constant 0 : index
    %0 = vector.load %arg1[%c0, %c0_0] : memref<1040x128xf32, #tpu.memory_space<vmem>>, vector<1040x128xf32>
    %cst = arith.constant 0.000000e+00 : f32
    %1 = vector.broadcast %cst : f32 to vector<1040x128xf32>
    %2 = arith.maximumf %0, %1 : vector<1040x128xf32>
    %c0_1 = arith.constant 0 : index
    %c0_2 = arith.constant 0 : index
    %3 = vector.load %arg2[%c0_1, %c0_2] : memref<1040x128xf32, #tpu.memory_space<vmem>>, vector<1040x128xf32>
    tpu.vector_store %arg2[%c0_1, %c0_2], %2 {strides = array<i32>} : memref<1040x128xf32, #tpu.memory_space<vmem>>, vector<1040x128xf32>,
    return
  }
  func.func @transform_0(%arg0: i32) -> (i32, i32) {
    %c0_i32 = arith.constant 0 : i32
    %c0_i32_0 = arith.constant 0 : i32
    return %arg0, %c0_i32 : i32, i32
  }
  func.func @transform_1(%arg0: i32) -> (i32, i32) {
    %c0_i32 = arith.constant 0 : i32
    %c0_i32_0 = arith.constant 0 : i32
    return %arg0, %c0_i32 : i32, i32
  }
}

</mosaic_0001>

<bundles_post_ra>
// kernel: tpu_custom_call.1
= control target key start
LH: loop header
LB: loop body
LE: loop exit
PB: predicated region body
PF: predicated region fallthrough
CT: control target
= control target key end

     0   :  { %6 = vsyncpa [#allocation3], 0  ;;  %s1235_s0 = inlined_call_operand.hbm [shape: f32[4141,128], index: 0, kind: input, shape index: {}]   ;;  %s1236_s1 = inlined_call_operand.hbm [shape: f32[4141,128], index: 1, kind: output, shape index: {}]  }
   0x1   :  { %8 = vsyncpa [#allocation3 + $0x1], 0 }
   0x2   :  { %9 = vsyncpa [#allocation4], 0 }
   0x3   :  { %11 = vsyncpa [#allocation4 + $0x1], 0  ;;  %s805_s6 = smov 0   ;;  %s807_s7 = smov 0  }
   0x4   :  { %s809_s8 = smov 0   ;;  %s811_s9 = smov 0  }
   0x5 LB: > { %s826_s10 = sadd.s32 4294967295, %s787_s9   ;;  %s634_s11 = sadd.s32 4294967294, %s787_s9   ;;  %s787_s9 = sphi %s811_s9, %s1244_s9   ;;  %s783_s8 = sphi %s809_s8, %s1243_s8   ;;  %s779_s7 = sphi %s807_s7, %s1242_s7   ;;  %s775_s6 = sphi %s805_s6, %s1241_s6  }
   0x6   : > { %s830_s12 = sadd.s32 1, %s787_s9   ;;  %s24_s13 = sadd.s32 1, %s783_s8 }
   0x7   : > { %s21_s14 = ssub.s32 %s787_s9, %s830_s12  ;;  %p31_p0 = scmp.ne.s32.totalorder %s783_s8, %s779_s7 }
   0x8   : > { %p22_p1 = scmp.eq.s32.totalorder %s21_s14, 0  ;;  %p32_p2 = scmp.eq.s32.totalorder %s787_s9, 0 }
   0x9   : > { %p37_p3 = scmp.ne.s32.totalorder %s779_s7, %s775_s6  ;;  %p38_p4 = scmp.eq.s32.totalorder %s826_s10, 0 }
   0xa   : > { %s842_s15 = scalar_select %p22_p1, %s783_s8, %s24_s13  }
   0xb   : > { %p33_p5 = por %p32_p2, %p31_p0  ;;  %p844_p6 = por %p38_p4, %p37_p3 }
   0xc   : > { %p61_p7 = scmp.eq.s32.totalorder %s826_s10, 3  ;;  %p67_p8 = scmp.eq.s32.totalorder %s634_s11, 3 }
   0xd   : > { %p636_p11 = scmp.ge.s32.totalorder %s787_s9, 4 }
   0xe   : > { %p849_p9 = por %p61_p7, %p31_p0  ;;  %p853_p10 = por %p67_p8, %p37_p3 }
   0xf   : > { %83 = sbr.rel (%p636_p11) target bundleno = 54 (0x36), region = 16 }
  0x10   : > { %s1239_s18 = scalar_select %p853_p10, 1, 0 }
  0x14   : > { %86 = sbr.rel (!%p33_p5) target bundleno = 54 (0x36), region = 20  ;;  %s87_s19 = sand.u32 (%p33_p5), 1, %s783_s8  }
  0x15   : > { %s92_s20 = smul.u32 (%p33_p5), 130, %s787_s9  ;;  %s863_s25 = scalar_lea.sflag (%p33_p5), [#allocation3], %s87_s19 }
  0x16   : > { %s652_s21 = smul.u32 (%p33_p5), 1040, %s87_s19 }
  0x17   : > { %s93_s22 = ssub.s32 (%p33_p5), 518, %s92_s20 }
  0x18   : > { %p94_p12 = scmp.lt.s32.totalorder (%p33_p5), %s93_s22, 130  ;;  %s91_s26 = scalar_lea.vmem (%p33_p5), [#allocation2], %s652_s21 }
  0x1a   : > { %s1246_s22 = smov (!%p94_p12, %s93_s22), 130 }
  0x1b   : > { %s860_s23 = sshll.u32 %s1246_s22, 7 }
  0x1c   : > { %s98_s24 = ssub.s32 16640, %s860_s23 }
  0x1d   : > { %99 = vsyncadd %s863_s25, %s98_s24  ;;  %p638_p13 = scmp.ne.s32.totalorder %s860_s23, 0  ;;  %s650_s27 = smul.u32 16640, %s787_s9 }
  0x1e   : > { %s104_s28 = sshll.u32 %s91_s26, 4  ;;  %s701_s11 = scalar_lea.hbm %s1235_s0, 66304  ;;  %s873_s28 = int_to_ptr.vmem [resolvable:$true] %s104_s28 }
  0x1f   : > { %s871_s2 = scalar_lea.hbm %s1235_s0, %s650_s27 }
  0x20   : > { %s697_s3 = scalar_lea.hbm %s871_s2, %s860_s23  ;;  %p702_p3 = scmp.lt.s32.totalorder %s871_s2, %s1235_s0 }
  0x21   : > { %p698_p0 = scmp.ne.s32.totalorder %s871_s2, %s697_s3  ;;  %p703_p4 = scmp.lt.s32.totalorder %s701_s11, %s697_s3 }
  0x23   : > { %p699_p1 = pnand %p698_p0, %p638_p13  ;;  %p704_p5 = por %p703_p4, %p702_p3 }
  0x25   : > { %p700_p2 = pneg %p699_p1 }
  0x27   : > { %p705_p7 = pnand %p704_p5, %p700_p2 }
  0x29   : > { %708 = shalt.err (!%p705_p7)
}
  0x2a   : > { %s709_s19 = scalar_lea.vmem %s873_s28, %s860_s23  ;;  %s789_s20 = smov [#allocation2]  }
  0x2b   : > { %p710_p8 = scmp.ne.s32.totalorder %s873_s28, %s709_s19  ;;  %s713_s21 = sshll.u32 %s789_s20, 4  ;;  %s714_s21 = int_to_ptr.vmem [resolvable:$false] %s713_s21 }
  0x2c   : > { %s715_s22 = scalar_lea.vmem %s714_s21, 33280  ;;  %p716_p0 = scmp.lt.s32.totalorder %s873_s28, %s714_s21 }
  0x2d   : > { %p711_p11 = pnand %p710_p8, %p638_p13  ;;  %p717_p1 = scmp.lt.s32.totalorder %s715_s22, %s709_s19 }
  0x2f   : > { %p712_p12 = pneg %p711_p11  ;;  %p718_p10 = por %p717_p1, %p716_p0 }
  0x31   : > { %p719_p3 = pnand %p718_p10, %p712_p12 }
  0x33   : > { %722 = shalt.err (!%p719_p3)
}
  0x34   : > { %s790_s24 = smov 128   ;;  %s791_s26 = smov 8  }
  0x35   : > { %110 = dma.hbm_to_vmem [thread:$0]  (%p638_p13), %s871_s2, %s860_s23, %s873_s28, %s863_s25, %s790_s24, %s790_s24, %s791_s26  }
  0x36 PF: > { %p642_p2 = scmp.ge.s32.totalorder %s787_s9, 1  ;;  %p112_p4 = scmp.lt.s32.totalorder %s787_s9, 5 }
  0x38   : > { %p113_p5 = pnand %p642_p2, %p112_p4 }
  0x39   : > { %s902_s27 = sand.u32 (!%p113_p5), 1, %s779_s7  }
  0x3a   : > { %116 = sbr.rel (%p113_p5) target bundleno = 160 (0xa0), region = 24  ;;  %s119_s30 = scalar_lea.sflag (!%p113_p5), [#allocation3], %s902_s27 }
  0x3b   : > { %s653_s29 = smul.u32 (!%p113_p5), 1040, %s902_s27 }
  0x3d   : > { %s906_s3 = scalar_lea.vmem (!%p113_p5), [#allocation2], %s653_s29 }
  0x3f   : > { %766 = dma.done.wait (%p844_p6), %s119_s30, 16640  }
  0x40   : > { %768 = vsyncadd (%p844_p6), %s119_s30, 4294950656  ;;  %v151_v0 = vld [vmem:[%s906_s3] sm:$0xff]  ;;  %v152_v1 = vld [vmem:[%s906_s3 + $0x8] sm:$0xff]  ;;  %s921_s16 = scalar_lea.vmem [#allocation5], %s653_s29  ;;  %s542_s23 = scalar_lea.sflag [#allocation4], %s902_s27 }
  0x41   : > { %v153_v2 = vld [vmem:[%s906_s3 + $0x10] sm:$0xff]  ;;  %v281_v3 = vmax.f32 %v151_v0, 0.0  ;;  %v282_v4 = vmax.f32 %v152_v1, 0.0  ;;  %v154_v6 = vld [vmem:[%s906_s3 + $0x18] sm:$0xff]  ;;  %v155_v7 = vld [vmem:[%s906_s3 + $0x20] sm:$0xff]  ;;  %s549_s25 = smul.u32 (%p849_p9), 130, %s826_s10 }
  0x42   : > { %v283_v5 = vmax.f32 %v153_v2, 0.0  ;;  %v156_v8 = vld [vmem:[%s906_s3 + $0x28] sm:$0xff]  ;;  %v284_v9 = vmax.f32 %v154_v6, 0.0  ;;  %v285_v10 = vmax.f32 %v155_v7, 0.0  ;;  %v157_v12 = vld [vmem:[%s906_s3 + $0x30] sm:$0xff]  ;;  %v158_v13 = vld [vmem:[%s906_s3 + $0x38] sm:$0xff] }
  0x43   : > { %v286_v11 = vmax.f32 %v156_v8, 0.0  ;;  %v159_v14 = vld [vmem:[%s906_s3 + $0x40] sm:$0xff]  ;;  %411 = vst [vmem:[%s921_s16] sm:$0xff] %v281_v3  ;;  %412 = vst [vmem:[%s921_s16 + $0x8] sm:$0xff] %v282_v4  ;;  %v287_v15 = vmax.f32 %v157_v12, 0.0  ;;  %v288_v16 = vmax.f32 %v158_v13, 0.0  ;;  %v160_v18 = vld [vmem:[%s906_s3 + $0x48] sm:$0xff] }
  0x44   : > { %413 = vst [vmem:[%s921_s16 + $0x10] sm:$0xff] %v283_v5  ;;  %v289_v17 = vmax.f32 %v159_v14, 0.0  ;;  %v161_v19 = vld [vmem:[%s906_s3 + $0x50] sm:$0xff]  ;;  %v162_v20 = vld [vmem:[%s906_s3 + $0x58] sm:$0xff]  ;;  %414 = vst [vmem:[%s921_s16 + $0x18] sm:$0xff] %v284_v9  ;;  %v290_v21 = vmax.f32 %v160_v18, 0.0 }
  0x45   : > { %415 = vst [vmem:[%s921_s16 + $0x20] sm:$0xff] %v285_v10  ;;  %416 = vst [vmem:[%s921_s16 + $0x28] sm:$0xff] %v286_v11  ;;  %v291_v22 = vmax.f32 %v161_v19, 0.0  ;;  %v292_v23 = vmax.f32 %v162_v20, 0.0  ;;  %v163_v24 = vld [vmem:[%s906_s3 + $0x60] sm:$0xff]  ;;  %v164_v25 = vld [vmem:[%s906_s3 + $0x68] sm:$0xff] }
  0x46   : > { %v165_v26 = vld [vmem:[%s906_s3 + $0x70] sm:$0xff]  ;;  %417 = vst [vmem:[%s921_s16 + $0x30] sm:$0xff] %v287_v15  ;;  %418 = vst [vmem:[%s921_s16 + $0x38] sm:$0xff] %v288_v16  ;;  %v293_v27 = vmax.f32 %v163_v24, 0.0  ;;  %v294_v28 = vmax.f32 %v164_v25, 0.0  ;;  %v166_v30 = vld [vmem:[%s906_s3 + $0x78] sm:$0xff] }
  0x47   : > { %419 = vst [vmem:[%s921_s16 + $0x40] sm:$0xff] %v289_v17  ;;  %v295_v29 = vmax.f32 %v165_v26, 0.0  ;;  %v167_v31 = vld [vmem:[%s906_s3 + $0x80] sm:$0xff]  ;;  %v168_v32 = vld [vmem:[%s906_s3 + $0x88] sm:$0xff]  ;;  %420 = vst [vmem:[%s921_s16 + $0x48] sm:$0xff] %v290_v21  ;;  %v296_v33 = vmax.f32 %v166_v30, 0.0 }
  0x48   : > { %421 = vst [vmem:[%s921_s16 + $0x50] sm:$0xff] %v291_v22  ;;  %422 = vst [vmem:[%s921_s16 + $0x58] sm:$0xff] %v292_v23  ;;  %v297_v34 = vmax.f32 %v167_v31, 0.0  ;;  %v298_v35 = vmax.f32 %v168_v32, 0.0  ;;  %v169_v36 = vld [vmem:[%s906_s3 + $0x90] sm:$0xff]  ;;  %v170_v37 = vld [vmem:[%s906_s3 + $0x98] sm:$0xff] }
  0x49   : > { %v171_v38 = vld [vmem:[%s906_s3 + $0xa0] sm:$0xff]  ;;  %423 = vst [vmem:[%s921_s16 + $0x60] sm:$0xff] %v293_v27  ;;  %424 = vst [vmem:[%s921_s16 + $0x68] sm:$0xff] %v294_v28  ;;  %v299_v39 = vmax.f32 %v169_v36, 0.0  ;;  %v300_v40 = vmax.f32 %v170_v37, 0.0  ;;  %v172_v42 = vld [vmem:[%s906_s3 + $0xa8] sm:$0xff] }
  0x4a   : > { %425 = vst [vmem:[%s921_s16 + $0x70] sm:$0xff] %v295_v29  ;;  %v301_v41 = vmax.f32 %v171_v38, 0.0  ;;  %v173_v43 = vld [vmem:[%s906_s3 + $0xb0] sm:$0xff]  ;;  %v174_v44 = vld [vmem:[%s906_s3 + $0xb8] sm:$0xff]  ;;  %426 = vst [vmem:[%s921_s16 + $0x78] sm:$0xff] %v296_v33  ;;  %v302_v45 = vmax.f32 %v172_v42, 0.0 }
  0x4b   : > { %427 = vst [vmem:[%s921_s16 + $0x80] sm:$0xff] %v297_v34  ;;  %428 = vst [vmem:[%s921_s16 + $0x88] sm:$0xff] %v298_v35  ;;  %v303_v46 = vmax.f32 %v173_v43, 0.0  ;;  %v304_v47 = vmax.f32 %v174_v44, 0.0  ;;  %v175_v48 = vld [vmem:[%s906_s3 + $0xc0] sm:$0xff]  ;;  %v176_v49 = vld [vmem:[%s906_s3 + $0xc8] sm:$0xff] }
  0x4c   : > { %v177_v50 = vld [vmem:[%s906_s3 + $0xd0] sm:$0xff]  ;;  %429 = vst [vmem:[%s921_s16 + $0x90] sm:$0xff] %v299_v39  ;;  %430 = vst [vmem:[%s921_s16 + $0x98] sm:$0xff] %v300_v40  ;;  %v305_v51 = vmax.f32 %v175_v48, 0.0  ;;  %v306_v52 = vmax.f32 %v176_v49, 0.0  ;;  %v178_v54 = vld [vmem:[%s906_s3 + $0xd8] sm:$0xff] }
  0x4d   : > { %431 = vst [vmem:[%s921_s16 + $0xa0] sm:$0xff] %v301_v41  ;;  %v307_v53 = vmax.f32 %v177_v50, 0.0  ;;  %v179_v55 = vld [vmem:[%s906_s3 + $0xe0] sm:$0xff]  ;;  %v180_v56 = vld [vmem:[%s906_s3 + $0xe8] sm:$0xff]  ;;  %432 = vst [vmem:[%s921_s16 + $0xa8] sm:$0xff] %v302_v45  ;;  %v308_v57 = vmax.f32 %v178_v54, 0.0 }
  0x4e   : > { %433 = vst [vmem:[%s921_s16 + $0xb0] sm:$0xff] %v303_v46  ;;  %434 = vst [vmem:[%s921_s16 + $0xb8] sm:$0xff] %v304_v47  ;;  %v309_v58 = vmax.f32 %v179_v55, 0.0  ;;  %v310_v59 = vmax.f32 %v180_v56, 0.0  ;;  %v181_v60 = vld [vmem:[%s906_s3 + $0xf0] sm:$0xff]  ;;  %v182_v61 = vld [vmem:[%s906_s3 + $0xf8] sm:$0xff] }
  0x4f   : > { %v183_v62 = vld [vmem:[%s906_s3 + $0x100] sm:$0xff]  ;;  %435 = vst [vmem:[%s921_s16 + $0xc0] sm:$0xff] %v305_v51  ;;  %436 = vst [vmem:[%s921_s16 + $0xc8] sm:$0xff] %v306_v52  ;;  %v311_v63 = vmax.f32 %v181_v60, 0.0  ;;  %v312_v0 = vmax.f32 %v182_v61, 0.0  ;;  %v184_v2 = vld [vmem:[%s906_s3 + $0x108] sm:$0xff] }
  0x50   : > { %437 = vst [vmem:[%s921_s16 + $0xd0] sm:$0xff] %v307_v53  ;;  %v313_v1 = vmax.f32 %v183_v62, 0.0  ;;  %v185_v3 = vld [vmem:[%s906_s3 + $0x110] sm:$0xff]  ;;  %v186_v4 = vld [vmem:[%s906_s3 + $0x118] sm:$0xff]  ;;  %438 = vst [vmem:[%s921_s16 + $0xd8] sm:$0xff] %v308_v57  ;;  %v314_v5 = vmax.f32 %v184_v2, 0.0 }
  0x51   : > { %439 = vst [vmem:[%s921_s16 + $0xe0] sm:$0xff] %v309_v58  ;;  %440 = vst [vmem:[%s921_s16 + $0xe8] sm:$0xff] %v310_v59  ;;  %v315_v6 = vmax.f32 %v185_v3, 0.0  ;;  %v316_v7 = vmax.f32 %v186_v4, 0.0  ;;  %v187_v8 = vld [vmem:[%s906_s3 + $0x120] sm:$0xff]  ;;  %v188_v9 = vld [vmem:[%s906_s3 + $0x128] sm:$0xff] }
  0x52   : > { %v189_v10 = vld [vmem:[%s906_s3 + $0x130] sm:$0xff]  ;;  %441 = vst [vmem:[%s921_s16 + $0xf0] sm:$0xff] %v311_v63  ;;  %442 = vst [vmem:[%s921_s16 + $0xf8] sm:$0xff] %v312_v0  ;;  %v317_v11 = vmax.f32 %v187_v8, 0.0  ;;  %v318_v12 = vmax.f32 %v188_v9, 0.0  ;;  %v190_v14 = vld [vmem:[%s906_s3 + $0x138] sm:$0xff] }
  0x53   : > { %443 = vst [vmem:[%s921_s16 + $0x100] sm:$0xff] %v313_v1  ;;  %v319_v13 = vmax.f32 %v189_v10, 0.0  ;;  %v191_v15 = vld [vmem:[%s906_s3 + $0x140] sm:$0xff]  ;;  %v192_v16 = vld [vmem:[%s906_s3 + $0x148] sm:$0xff]  ;;  %444 = vst [vmem:[%s921_s16 + $0x108] sm:$0xff] %v314_v5  ;;  %v320_v17 = vmax.f32 %v190_v14, 0.0 }
  0x54   : > { %445 = vst [vmem:[%s921_s16 + $0x110] sm:$0xff] %v315_v6  ;;  %446 = vst [vmem:[%s921_s16 + $0x118] sm:$0xff] %v316_v7  ;;  %v321_v18 = vmax.f32 %v191_v15, 0.0  ;;  %v322_v19 = vmax.f32 %v192_v16, 0.0  ;;  %v193_v20 = vld [vmem:[%s906_s3 + $0x150] sm:$0xff]  ;;  %v194_v21 = vld [vmem:[%s906_s3 + $0x158] sm:$0xff] }
  0x55   : > { %v195_v22 = vld [vmem:[%s906_s3 + $0x160] sm:$0xff]  ;;  %447 = vst [vmem:[%s921_s16 + $0x120] sm:$0xff] %v317_v11  ;;  %448 = vst [vmem:[%s921_s16 + $0x128] sm:$0xff] %v318_v12  ;;  %v323_v23 = vmax.f32 %v193_v20, 0.0  ;;  %v324_v24 = vmax.f32 %v194_v21, 0.0  ;;  %v196_v26 = vld [vmem:[%s906_s3 + $0x168] sm:$0xff] }
  0x56   : > { %449 = vst [vmem:[%s921_s16 + $0x130] sm:$0xff] %v319_v13  ;;  %v325_v25 = vmax.f32 %v195_v22, 0.0  ;;  %v197_v27 = vld [vmem:[%s906_s3 + $0x170] sm:$0xff]  ;;  %v198_v28 = vld [vmem:[%s906_s3 + $0x178] sm:$0xff]  ;;  %450 = vst [vmem:[%s921_s16 + $0x138] sm:$0xff] %v320_v17  ;;  %v326_v29 = vmax.f32 %v196_v26, 0.0 }
  0x57   : > { %451 = vst [vmem:[%s921_s16 + $0x140] sm:$0xff] %v321_v18  ;;  %452 = vst [vmem:[%s921_s16 + $0x148] sm:$0xff] %v322_v19  ;;  %v327_v30 = vmax.f32 %v197_v27, 0.0  ;;  %v328_v31 = vmax.f32 %v198_v28, 0.0  ;;  %v199_v32 = vld [vmem:[%s906_s3 + $0x180] sm:$0xff]  ;;  %v200_v33 = vld [vmem:[%s906_s3 + $0x188] sm:$0xff] }
  0x58   : > { %v201_v34 = vld [vmem:[%s906_s3 + $0x190] sm:$0xff]  ;;  %453 = vst [vmem:[%s921_s16 + $0x150] sm:$0xff] %v323_v23  ;;  %454 = vst [vmem:[%s921_s16 + $0x158] sm:$0xff] %v324_v24  ;;  %v329_v35 = vmax.f32 %v199_v32, 0.0  ;;  %v330_v36 = vmax.f32 %v200_v33, 0.0  ;;  %v202_v38 = vld [vmem:[%s906_s3 + $0x198] sm:$0xff] }
  0x59   : > { %455 = vst [vmem:[%s921_s16 + $0x160] sm:$0xff] %v325_v25  ;;  %v331_v37 = vmax.f32 %v201_v34, 0.0  ;;  %v203_v39 = vld [vmem:[%s906_s3 + $0x1a0] sm:$0xff]  ;;  %v204_v40 = vld [vmem:[%s906_s3 + $0x1a8] sm:$0xff]  ;;  %456 = vst [vmem:[%s921_s16 + $0x168] sm:$0xff] %v326_v29  ;;  %v332_v41 = vmax.f32 %v202_v38, 0.0 }
  0x5a   : > { %457 = vst [vmem:[%s921_s16 + $0x170] sm:$0xff] %v327_v30  ;;  %458 = vst [vmem:[%s921_s16 + $0x178] sm:$0xff] %v328_v31  ;;  %v333_v42 = vmax.f32 %v203_v39, 0.0  ;;  %v334_v43 = vmax.f32 %v204_v40, 0.0  ;;  %v205_v44 = vld [vmem:[%s906_s3 + $0x1b0] sm:$0xff]  ;;  %v206_v45 = vld [vmem:[%s906_s3 + $0x1b8] sm:$0xff] }
  0x5b   : > { %v207_v46 = vld [vmem:[%s906_s3 + $0x1c0] sm:$0xff]  ;;  %459 = vst [vmem:[%s921_s16 + $0x180] sm:$0xff] %v329_v35  ;;  %460 = vst [vmem:[%s921_s16 + $0x188] sm:$0xff] %v330_v36  ;;  %v335_v47 = vmax.f32 %v205_v44, 0.0  ;;  %v336_v48 = vmax.f32 %v206_v45, 0.0  ;;  %v208_v50 = vld [vmem:[%s906_s3 + $0x1c8] sm:$0xff] }
  0x5c   : > { %461 = vst [vmem:[%s921_s16 + $0x190] sm:$0xff] %v331_v37  ;;  %v337_v49 = vmax.f32 %v207_v46, 0.0  ;;  %v209_v51 = vld [vmem:[%s906_s3 + $0x1d0] sm:$0xff]  ;;  %v210_v52 = vld [vmem:[%s906_s3 + $0x1d8] sm:$0xff]  ;;  %462 = vst [vmem:[%s921_s16 + $0x198] sm:$0xff] %v332_v41  ;;  %v338_v53 = vmax.f32 %v208_v50, 0.0 }
  0x5d   : > { %463 = vst [vmem:[%s921_s16 + $0x1a0] sm:$0xff] %v333_v42  ;;  %464 = vst [vmem:[%s921_s16 + $0x1a8] sm:$0xff] %v334_v43  ;;  %v339_v54 = vmax.f32 %v209_v51, 0.0  ;;  %v340_v55 = vmax.f32 %v210_v52, 0.0  ;;  %v211_v56 = vld [vmem:[%s906_s3 + $0x1e0] sm:$0xff]  ;;  %v212_v57 = vld [vmem:[%s906_s3 + $0x1e8] sm:$0xff] }
  0x5e   : > { %v213_v58 = vld [vmem:[%s906_s3 + $0x1f0] sm:$0xff]  ;;  %465 = vst [vmem:[%s921_s16 + $0x1b0] sm:$0xff] %v335_v47  ;;  %466 = vst [vmem:[%s921_s16 + $0x1b8] sm:$0xff] %v336_v48  ;;  %v341_v59 = vmax.f32 %v211_v56, 0.0  ;;  %v342_v60 = vmax.f32 %v212_v57, 0.0  ;;  %v214_v62 = vld [vmem:[%s906_s3 + $0x1f8] sm:$0xff] }
  0x5f   : > { %467 = vst [vmem:[%s921_s16 + $0x1c0] sm:$0xff] %v337_v49  ;;  %v343_v61 = vmax.f32 %v213_v58, 0.0  ;;  %v215_v63 = vld [vmem:[%s906_s3 + $0x200] sm:$0xff]  ;;  %v216_v0 = vld [vmem:[%s906_s3 + $0x208] sm:$0xff]  ;;  %468 = vst [vmem:[%s921_s16 + $0x1c8] sm:$0xff] %v338_v53  ;;  %v344_v1 = vmax.f32 %v214_v62, 0.0 }
  0x60   : > { %469 = vst [vmem:[%s921_s16 + $0x1d0] sm:$0xff] %v339_v54  ;;  %470 = vst [vmem:[%s921_s16 + $0x1d8] sm:$0xff] %v340_v55  ;;  %v345_v2 = vmax.f32 %v215_v63, 0.0  ;;  %v346_v3 = vmax.f32 %v216_v0, 0.0  ;;  %v217_v4 = vld [vmem:[%s906_s3 + $0x210] sm:$0xff]  ;;  %v218_v5 = vld [vmem:[%s906_s3 + $0x218] sm:$0xff] }
  0x61   : > { %v219_v6 = vld [vmem:[%s906_s3 + $0x220] sm:$0xff]  ;;  %471 = vst [vmem:[%s921_s16 + $0x1e0] sm:$0xff] %v341_v59  ;;  %472 = vst [vmem:[%s921_s16 + $0x1e8] sm:$0xff] %v342_v60  ;;  %v347_v7 = vmax.f32 %v217_v4, 0.0  ;;  %v348_v8 = vmax.f32 %v218_v5, 0.0  ;;  %v220_v10 = vld [vmem:[%s906_s3 + $0x228] sm:$0xff] }
  0x62   : > { %473 = vst [vmem:[%s921_s16 + $0x1f0] sm:$0xff] %v343_v61  ;;  %v349_v9 = vmax.f32 %v219_v6, 0.0  ;;  %v221_v11 = vld [vmem:[%s906_s3 + $0x230] sm:$0xff]  ;;  %v222_v12 = vld [vmem:[%s906_s3 + $0x238] sm:$0xff]  ;;  %474 = vst [vmem:[%s921_s16 + $0x1f8] sm:$0xff] %v344_v1  ;;  %v350_v13 = vmax.f32 %v220_v10, 0.0 }
  0x63   : > { %475 = vst [vmem:[%s921_s16 + $0x200] sm:$0xff] %v345_v2  ;;  %476 = vst [vmem:[%s921_s16 + $0x208] sm:$0xff] %v346_v3  ;;  %v351_v14 = vmax.f32 %v221_v11, 0.0  ;;  %v352_v15 = vmax.f32 %v222_v12, 0.0  ;;  %v223_v16 = vld [vmem:[%s906_s3 + $0x240] sm:$0xff]  ;;  %v224_v17 = vld [vmem:[%s906_s3 + $0x248] sm:$0xff] }
  0x64   : > { %v225_v18 = vld [vmem:[%s906_s3 + $0x250] sm:$0xff]  ;;  %477 = vst [vmem:[%s921_s16 + $0x210] sm:$0xff] %v347_v7  ;;  %478 = vst [vmem:[%s921_s16 + $0x218] sm:$0xff] %v348_v8  ;;  %v353_v19 = vmax.f32 %v223_v16, 0.0  ;;  %v354_v20 = vmax.f32 %v224_v17, 0.0  ;;  %v226_v22 = vld [vmem:[%s906_s3 + $0x258] sm:$0xff] }
  0x65   : > { %479 = vst [vmem:[%s921_s16 + $0x220] sm:$0xff] %v349_v9  ;;  %v355_v21 = vmax.f32 %v225_v18, 0.0  ;;  %v227_v23 = vld [vmem:[%s906_s3 + $0x260] sm:$0xff]  ;;  %v228_v24 = vld [vmem:[%s906_s3 + $0x268] sm:$0xff]  ;;  %480 = vst [vmem:[%s921_s16 + $0x228] sm:$0xff] %v350_v13  ;;  %v356_v25 = vmax.f32 %v226_v22, 0.0 }
  0x66   : > { %481 = vst [vmem:[%s921_s16 + $0x230] sm:$0xff] %v351_v14  ;;  %482 = vst [vmem:[%s921_s16 + $0x238] sm:$0xff] %v352_v15  ;;  %v357_v26 = vmax.f32 %v227_v23, 0.0  ;;  %v358_v27 = vmax.f32 %v228_v24, 0.0  ;;  %v229_v28 = vld [vmem:[%s906_s3 + $0x270] sm:$0xff]  ;;  %v230_v29 = vld [vmem:[%s906_s3 + $0x278] sm:$0xff] }
  0x67   : > { %v231_v30 = vld [vmem:[%s906_s3 + $0x280] sm:$0xff]  ;;  %483 = vst [vmem:[%s921_s16 + $0x240] sm:$0xff] %v353_v19  ;;  %484 = vst [vmem:[%s921_s16 + $0x248] sm:$0xff] %v354_v20  ;;  %v359_v31 = vmax.f32 %v229_v28, 0.0  ;;  %v360_v32 = vmax.f32 %v230_v29, 0.0  ;;  %v232_v34 = vld [vmem:[%s906_s3 + $0x288] sm:$0xff] }
  0x68   : > { %485 = vst [vmem:[%s921_s16 + $0x250] sm:$0xff] %v355_v21  ;;  %v361_v33 = vmax.f32 %v231_v30, 0.0  ;;  %v233_v35 = vld [vmem:[%s906_s3 + $0x290] sm:$0xff]  ;;  %v234_v36 = vld [vmem:[%s906_s3 + $0x298] sm:$0xff]  ;;  %486 = vst [vmem:[%s921_s16 + $0x258] sm:$0xff] %v356_v25  ;;  %v362_v37 = vmax.f32 %v232_v34, 0.0 }
  0x69   : > { %487 = vst [vmem:[%s921_s16 + $0x260] sm:$0xff] %v357_v26  ;;  %488 = vst [vmem:[%s921_s16 + $0x268] sm:$0xff] %v358_v27  ;;  %v363_v38 = vmax.f32 %v233_v35, 0.0  ;;  %v364_v39 = vmax.f32 %v234_v36, 0.0  ;;  %v235_v40 = vld [vmem:[%s906_s3 + $0x2a0] sm:$0xff]  ;;  %v236_v41 = vld [vmem:[%s906_s3 + $0x2a8] sm:$0xff] }
  0x6a   : > { %v237_v42 = vld [vmem:[%s906_s3 + $0x2b0] sm:$0xff]  ;;  %489 = vst [vmem:[%s921_s16 + $0x270] sm:$0xff] %v359_v31  ;;  %490 = vst [vmem:[%s921_s16 + $0x278] sm:$0xff] %v360_v32  ;;  %v365_v43 = vmax.f32 %v235_v40, 0.0  ;;  %v366_v44 = vmax.f32 %v236_v41, 0.0  ;;  %v238_v46 = vld [vmem:[%s906_s3 + $0x2b8] sm:$0xff] }
  0x6b   : > { %491 = vst [vmem:[%s921_s16 + $0x280] sm:$0xff] %v361_v33  ;;  %v367_v45 = vmax.f32 %v237_v42, 0.0  ;;  %v239_v47 = vld [vmem:[%s906_s3 + $0x2c0] sm:$0xff]  ;;  %v240_v48 = vld [vmem:[%s906_s3 + $0x2c8] sm:$0xff]  ;;  %492 = vst [vmem:[%s921_s16 + $0x288] sm:$0xff] %v362_v37  ;;  %v368_v49 = vmax.f32 %v238_v46, 0.0 }
  0x6c   : > { %493 = vst [vmem:[%s921_s16 + $0x290] sm:$0xff] %v363_v38  ;;  %494 = vst [vmem:[%s921_s16 + $0x298] sm:$0xff] %v364_v39  ;;  %v369_v50 = vmax.f32 %v239_v47, 0.0  ;;  %v370_v51 = vmax.f32 %v240_v48, 0.0  ;;  %v241_v52 = vld [vmem:[%s906_s3 + $0x2d0] sm:$0xff]  ;;  %v242_v53 = vld [vmem:[%s906_s3 + $0x2d8] sm:$0xff] }
  0x6d   : > { %v243_v54 = vld [vmem:[%s906_s3 + $0x2e0] sm:$0xff]  ;;  %495 = vst [vmem:[%s921_s16 + $0x2a0] sm:$0xff] %v365_v43  ;;  %496 = vst [vmem:[%s921_s16 + $0x2a8] sm:$0xff] %v366_v44  ;;  %v371_v55 = vmax.f32 %v241_v52, 0.0  ;;  %v372_v56 = vmax.f32 %v242_v53, 0.0  ;;  %v244_v58 = vld [vmem:[%s906_s3 + $0x2e8] sm:$0xff] }
  0x6e   : > { %497 = vst [vmem:[%s921_s16 + $0x2b0] sm:$0xff] %v367_v45  ;;  %v373_v57 = vmax.f32 %v243_v54, 0.0  ;;  %v245_v59 = vld [vmem:[%s906_s3 + $0x2f0] sm:$0xff]  ;;  %v246_v60 = vld [vmem:[%s906_s3 + $0x2f8] sm:$0xff]  ;;  %498 = vst [vmem:[%s921_s16 + $0x2b8] sm:$0xff] %v368_v49  ;;  %v374_v61 = vmax.f32 %v244_v58, 0.0 }
  0x6f   : > { %499 = vst [vmem:[%s921_s16 + $0x2c0] sm:$0xff] %v369_v50  ;;  %500 = vst [vmem:[%s921_s16 + $0x2c8] sm:$0xff] %v370_v51  ;;  %v375_v62 = vmax.f32 %v245_v59, 0.0  ;;  %v376_v63 = vmax.f32 %v246_v60, 0.0  ;;  %v247_v0 = vld [vmem:[%s906_s3 + $0x300] sm:$0xff]  ;;  %v248_v1 = vld [vmem:[%s906_s3 + $0x308] sm:$0xff] }
  0x70   : > { %v249_v2 = vld [vmem:[%s906_s3 + $0x310] sm:$0xff]  ;;  %501 = vst [vmem:[%s921_s16 + $0x2d0] sm:$0xff] %v371_v55  ;;  %502 = vst [vmem:[%s921_s16 + $0x2d8] sm:$0xff] %v372_v56  ;;  %v377_v3 = vmax.f32 %v247_v0, 0.0  ;;  %v378_v4 = vmax.f32 %v248_v1, 0.0  ;;  %v250_v6 = vld [vmem:[%s906_s3 + $0x318] sm:$0xff] }
  0x71   : > { %503 = vst [vmem:[%s921_s16 + $0x2e0] sm:$0xff] %v373_v57  ;;  %v379_v5 = vmax.f32 %v249_v2, 0.0  ;;  %v251_v7 = vld [vmem:[%s906_s3 + $0x320] sm:$0xff]  ;;  %v252_v8 = vld [vmem:[%s906_s3 + $0x328] sm:$0xff]  ;;  %504 = vst [vmem:[%s921_s16 + $0x2e8] sm:$0xff] %v374_v61  ;;  %v380_v9 = vmax.f32 %v250_v6, 0.0 }
  0x72   : > { %505 = vst [vmem:[%s921_s16 + $0x2f0] sm:$0xff] %v375_v62  ;;  %506 = vst [vmem:[%s921_s16 + $0x2f8] sm:$0xff] %v376_v63  ;;  %v381_v10 = vmax.f32 %v251_v7, 0.0  ;;  %v382_v11 = vmax.f32 %v252_v8, 0.0  ;;  %v253_v12 = vld [vmem:[%s906_s3 + $0x330] sm:$0xff]  ;;  %v254_v13 = vld [vmem:[%s906_s3 + $0x338] sm:$0xff] }
  0x73   : > { %v255_v14 = vld [vmem:[%s906_s3 + $0x340] sm:$0xff]  ;;  %507 = vst [vmem:[%s921_s16 + $0x300] sm:$0xff] %v377_v3  ;;  %508 = vst [vmem:[%s921_s16 + $0x308] sm:$0xff] %v378_v4  ;;  %v383_v15 = vmax.f32 %v253_v12, 0.0  ;;  %v384_v16 = vmax.f32 %v254_v13, 0.0  ;;  %v256_v18 = vld [vmem:[%s906_s3 + $0x348] sm:$0xff] }
  0x74   : > { %509 = vst [vmem:[%s921_s16 + $0x310] sm:$0xff] %v379_v5  ;;  %v385_v17 = vmax.f32 %v255_v14, 0.0  ;;  %v257_v19 = vld [vmem:[%s906_s3 + $0x350] sm:$0xff]  ;;  %v258_v20 = vld [vmem:[%s906_s3 + $0x358] sm:$0xff]  ;;  %510 = vst [vmem:[%s921_s16 + $0x318] sm:$0xff] %v380_v9  ;;  %v386_v21 = vmax.f32 %v256_v18, 0.0 }
  0x75   : > { %511 = vst [vmem:[%s921_s16 + $0x320] sm:$0xff] %v381_v10  ;;  %512 = vst [vmem:[%s921_s16 + $0x328] sm:$0xff] %v382_v11  ;;  %v387_v22 = vmax.f32 %v257_v19, 0.0  ;;  %v388_v23 = vmax.f32 %v258_v20, 0.0  ;;  %v259_v24 = vld [vmem:[%s906_s3 + $0x360] sm:$0xff]  ;;  %v260_v25 = vld [vmem:[%s906_s3 + $0x368] sm:$0xff] }
  0x76   : > { %v261_v26 = vld [vmem:[%s906_s3 + $0x370] sm:$0xff]  ;;  %513 = vst [vmem:[%s921_s16 + $0x330] sm:$0xff] %v383_v15  ;;  %514 = vst [vmem:[%s921_s16 + $0x338] sm:$0xff] %v384_v16  ;;  %v389_v27 = vmax.f32 %v259_v24, 0.0  ;;  %v390_v28 = vmax.f32 %v260_v25, 0.0  ;;  %v262_v30 = vld [vmem:[%s906_s3 + $0x378] sm:$0xff] }
  0x77   : > { %515 = vst [vmem:[%s921_s16 + $0x340] sm:$0xff] %v385_v17  ;;  %v391_v29 = vmax.f32 %v261_v26, 0.0  ;;  %v263_v31 = vld [vmem:[%s906_s3 + $0x380] sm:$0xff]  ;;  %v264_v32 = vld [vmem:[%s906_s3 + $0x388] sm:$0xff]  ;;  %516 = vst [vmem:[%s921_s16 + $0x348] sm:$0xff] %v386_v21  ;;  %v392_v33 = vmax.f32 %v262_v30, 0.0 }
  0x78   : > { %517 = vst [vmem:[%s921_s16 + $0x350] sm:$0xff] %v387_v22  ;;  %518 = vst [vmem:[%s921_s16 + $0x358] sm:$0xff] %v388_v23  ;;  %v393_v34 = vmax.f32 %v263_v31, 0.0  ;;  %v394_v35 = vmax.f32 %v264_v32, 0.0  ;;  %v265_v36 = vld [vmem:[%s906_s3 + $0x390] sm:$0xff]  ;;  %v266_v37 = vld [vmem:[%s906_s3 + $0x398] sm:$0xff] }
  0x79   : > { %v267_v38 = vld [vmem:[%s906_s3 + $0x3a0] sm:$0xff]  ;;  %519 = vst [vmem:[%s921_s16 + $0x360] sm:$0xff] %v389_v27  ;;  %520 = vst [vmem:[%s921_s16 + $0x368] sm:$0xff] %v390_v28  ;;  %v395_v39 = vmax.f32 %v265_v36, 0.0  ;;  %v396_v40 = vmax.f32 %v266_v37, 0.0  ;;  %v268_v42 = vld [vmem:[%s906_s3 + $0x3a8] sm:$0xff] }
  0x7a   : > { %521 = vst [vmem:[%s921_s16 + $0x370] sm:$0xff] %v391_v29  ;;  %v397_v41 = vmax.f32 %v267_v38, 0.0  ;;  %v269_v43 = vld [vmem:[%s906_s3 + $0x3b0] sm:$0xff]  ;;  %v270_v44 = vld [vmem:[%s906_s3 + $0x3b8] sm:$0xff]  ;;  %522 = vst [vmem:[%s921_s16 + $0x378] sm:$0xff] %v392_v33  ;;  %v398_v45 = vmax.f32 %v268_v42, 0.0 }
  0x7b   : > { %523 = vst [vmem:[%s921_s16 + $0x380] sm:$0xff] %v393_v34  ;;  %524 = vst [vmem:[%s921_s16 + $0x388] sm:$0xff] %v394_v35  ;;  %v399_v46 = vmax.f32 %v269_v43, 0.0  ;;  %v400_v47 = vmax.f32 %v270_v44, 0.0  ;;  %v271_v48 = vld [vmem:[%s906_s3 + $0x3c0] sm:$0xff]  ;;  %v272_v49 = vld [vmem:[%s906_s3 + $0x3c8] sm:$0xff] }
  0x7c   : > { %v273_v50 = vld [vmem:[%s906_s3 + $0x3d0] sm:$0xff]  ;;  %525 = vst [vmem:[%s921_s16 + $0x390] sm:$0xff] %v395_v39  ;;  %526 = vst [vmem:[%s921_s16 + $0x398] sm:$0xff] %v396_v40  ;;  %v401_v51 = vmax.f32 %v271_v48, 0.0  ;;  %v402_v52 = vmax.f32 %v272_v49, 0.0  ;;  %v274_v54 = vld [vmem:[%s906_s3 + $0x3d8] sm:$0xff] }
  0x7d   : > { %527 = vst [vmem:[%s921_s16 + $0x3a0] sm:$0xff] %v397_v41  ;;  %v403_v53 = vmax.f32 %v273_v50, 0.0  ;;  %v275_v55 = vld [vmem:[%s906_s3 + $0x3e0] sm:$0xff]  ;;  %v276_v56 = vld [vmem:[%s906_s3 + $0x3e8] sm:$0xff]  ;;  %528 = vst [vmem:[%s921_s16 + $0x3a8] sm:$0xff] %v398_v45  ;;  %v404_v57 = vmax.f32 %v274_v54, 0.0 }
  0x7e   : > { %529 = vst [vmem:[%s921_s16 + $0x3b0] sm:$0xff] %v399_v46  ;;  %530 = vst [vmem:[%s921_s16 + $0x3b8] sm:$0xff] %v400_v47  ;;  %v405_v58 = vmax.f32 %v275_v55, 0.0  ;;  %v406_v59 = vmax.f32 %v276_v56, 0.0  ;;  %v277_v60 = vld [vmem:[%s906_s3 + $0x3f0] sm:$0xff]  ;;  %v278_v61 = vld [vmem:[%s906_s3 + $0x3f8] sm:$0xff] }
  0x7f   : > { %v279_v62 = vld [vmem:[%s906_s3 + $0x400] sm:$0xff]  ;;  %531 = vst [vmem:[%s921_s16 + $0x3c0] sm:$0xff] %v401_v51  ;;  %532 = vst [vmem:[%s921_s16 + $0x3c8] sm:$0xff] %v402_v52  ;;  %v407_v63 = vmax.f32 %v277_v60, 0.0  ;;  %v408_v0 = vmax.f32 %v278_v61, 0.0  ;;  %v280_v2 = vld [vmem:[%s906_s3 + $0x408] sm:$0xff] }
  0x80   : > { %533 = vst [vmem:[%s921_s16 + $0x3d0] sm:$0xff] %v403_v53  ;;  %v409_v1 = vmax.f32 %v279_v62, 0.0  ;;  %534 = vst [vmem:[%s921_s16 + $0x3d8] sm:$0xff] %v404_v57  ;;  %v410_v3 = vmax.f32 %v280_v2, 0.0  ;;  %548 = sbr.rel (!%p849_p9) target bundleno = 160 (0xa0), region = 32  ;;  %s550_s28 = ssub.s32 (%p849_p9), 518, %s549_s25 }
  0x81   : > { %535 = vst [vmem:[%s921_s16 + $0x3e0] sm:$0xff] %v405_v58  ;;  %536 = vst [vmem:[%s921_s16 + $0x3e8] sm:$0xff] %v406_v59  ;;  %p551_p6 = scmp.lt.s32.totalorder (%p849_p9), %s550_s28, 130 }
  0x82   : > { %537 = vst [vmem:[%s921_s16 + $0x3f0] sm:$0xff] %v407_v63  ;;  %538 = vst [vmem:[%s921_s16 + $0x3f8] sm:$0xff] %v408_v0 }
  0x83   : > { %539 = vst [vmem:[%s921_s16 + $0x400] sm:$0xff] %v409_v1  ;;  %540 = vst [vmem:[%s921_s16 + $0x408] sm:$0xff] %v410_v3 }
  0x85   : > { %s1248_s28 = smov (!%p551_p6, %s550_s28), 130 }
  0x86   : > { %s1178_s2 = sshll.u32 %s1248_s28, 7 }
  0x87   : > { %s555_s4 = ssub.s32 16640, %s1178_s2 }
  0x88   : > { %556 = vsyncadd %s542_s23, %s555_s4  ;;  %p644_p10 = scmp.ne.s32.totalorder %s1178_s2, 0  ;;  %s651_s17 = smul.u32 16640, %s826_s10 }
  0x89   : > { %s561_s5 = sshll.u32 %s921_s16, 4  ;;  %s792_s20 = smov [#allocation5]   ;;  %s1191_s5 = int_to_ptr.vmem [resolvable:$true] %s561_s5 }
  0x8a   : > { %s1189_s14 = scalar_lea.hbm %s1236_s1, %s651_s17  ;;  %s723_s19 = scalar_lea.vmem %s1191_s5, %s1178_s2 }
  0x8b   : > { %p724_p9 = scmp.ne.s32.totalorder %s1191_s5, %s723_s19  ;;  %s727_s21 = sshll.u32 %s792_s20, 4  ;;  %s728_s21 = int_to_ptr.vmem [resolvable:$false] %s727_s21 }
  0x8c   : > { %s729_s10 = scalar_lea.vmem %s728_s21, 33280  ;;  %p730_p8 = scmp.lt.s32.totalorder %s1191_s5, %s728_s21 }
  0x8d   : > { %p725_p13 = pnand %p724_p9, %p644_p10  ;;  %p731_p11 = scmp.lt.s32.totalorder %s729_s10, %s723_s19 }
  0x8f   : > { %p726_p7 = pneg %p725_p13  ;;  %p732_p12 = por %p731_p11, %p730_p8 }
  0x91   : > { %p733_p0 = pnand %p732_p12, %p726_p7 }
  0x93   : > { %736 = shalt.err (!%p733_p0)
}
  0x94   : > { %s737_s22 = scalar_lea.hbm %s1189_s14, %s1178_s2  ;;  %s741_s29 = scalar_lea.hbm %s1236_s1, 66304 }
  0x95   : > { %p738_p1 = scmp.ne.s32.totalorder %s1189_s14, %s737_s22  ;;  %p742_p4 = scmp.lt.s32.totalorder %s1189_s14, %s1236_s1 }
  0x96   : > { %p743_p5 = scmp.lt.s32.totalorder %s741_s29, %s737_s22 }
  0x97   : > { %p739_p3 = pnand %p738_p1, %p644_p10 }
  0x98   : > { %p744_p6 = por %p743_p5, %p742_p4 }
  0x99   : > { %p740_p2 = pneg %p739_p3 }
  0x9b   : > { %p745_p9 = pnand %p744_p6, %p740_p2 }
  0x9d   : > { %748 = shalt.err (!%p745_p9)
}
  0x9e   : > { %s793_s16 = smov 128   ;;  %s794_s25 = smov 8  }
  0x9f   : > { %567 = dma.vmem_to_hbm [thread:$0]  (%p644_p10), %s1191_s5, %s1178_s2, %s1189_s14, %s542_s23, %s793_s16, %s793_s16, %s794_s25  }
  0xa0 PF: > { %p660_p13 = scmp.ge.s32.totalorder %s787_s9, 2  ;;  %s576_s28 = sand.u32 1, %s775_s6  }
  0xa1   : > { %p1240_p7 = scmp.ne.s32.totalorder %s1239_s18, 0  ;;  %s577_s4 = scalar_lea.sflag [#allocation4], %s576_s28 }
  0xa3   : > { %p657_p8 = pnand %p660_p13, %p1240_p7 }
  0xa5   : > { %p658_p11 = pneg %p657_p8 }
  0xa7   : > { %770 = dma.done.wait (%p658_p11), %s577_s4, 16640  }
  0xa8   : > { %772 = vsyncadd (%p658_p11), %s577_s4, 4294950656  ;;  %p14_p12 = scmp.ge.s32.totalorder %s830_s12, 6   ;;  %s1241_s6 = smov %s779_s7 }
  0xa9   : > { %s1242_s7 = smov %s783_s8  ;;  %s1243_s8 = smov %s842_s15 }
  0xaa   : > { %s1244_s9 = smov %s830_s12  ;;  %16 = sbr.rel (!%p14_p12) target bundleno = 5 (0x5), region = 69 }
  0xaf   :  { %582 = vsyncpa [#allocation3], 1 }
  0xb0   :  { %584 = vsyncpa [#allocation3 + $0x1], 1 }
  0xb1   :  { %585 = vsyncpa [#allocation4], 1 }
  0xb2   :  { %587 = vsyncpa [#allocation4 + $0x1], 1 }

</bundles_post_ra>
